<compile_context>
chip_gen: v7x
topology: tpu7x:2x2x1
jax: 0.10.0
libtpu: 0.0.40
codegen_flags: <defaults>
</compile_context>

<pallas_src>
import jax
import jax.numpy as jnp
from jax.experimental import pallas as pl
from jax.experimental.pallas import tpu as pltpu


def _round_up(n: int, m: int) -> int:
    return ((n + m - 1) // m) * m


def _vmem_capacity_bytes(default: int = 64 << 20) -> int:
    # Fallback is v7x's 64 MiB per-TensorCore VMEM (the smallest of v5e/v6e/v7x),
    # so a failed query can only make the tiling more conservative.
    try:
        return int(pltpu.get_tpu_info().vmem_capacity_bytes)
    except Exception:
        return default


def _choose_tm(B: int, F: int, itemsize: int, vmem_cap: int,
               *, buffers: int = 2, target_step_bytes: int = 2 << 20) -> int:
    """Pick the row-tile size TM (a multiple of 128, for the lane-dense output)."""
    f_lanes = _round_up(F, 128)          # lane padding of one X row in VMEM
    row_bytes = f_lanes * itemsize
    # (a) Amortize the ~0.35 us per-grid-step overhead: >= ~2 MiB of X per step.
    tm = _round_up(max(1, pl.cdiv(target_step_bytes, row_bytes)), 128)
    tm = max(tm, 1024)
    # (b) VMEM ceiling: double-buffered X tiles must stay under ~half of the
    #     physical VMEM (binding on v7x at large F; generous on v5e/v6e).
    tm_cap = (vmem_cap // 2) // (buffers * row_bytes)
    tm = min(tm, max(128, (tm_cap // 128) * 128))
    # (c) Never bigger than the (128-rounded) batch.
    tm = min(tm, max(128, _round_up(B, 128)))
    # (d) Keep both v7x TensorCores fed: >= 2 tiles whenever the batch allows.
    if B >= 256 and pl.cdiv(B, tm) < 2:
        tm = max(128, _round_up(pl.cdiv(B, 2), 128))
    return tm


def _logreg_kernel(x_ref, w_ref, b_ref, o_ref):
    # x_ref: (TM, F) VMEM   w_ref: (1, F) VMEM   b_ref: (1,) SMEM   o_ref: (1, TM)
    # logits[0, t] = sum_f w[0, f] * x[t, f]  -- MXU dot contracting the feature
    # axis of BOTH operands (trans-B), f32 accumulation.  This directly yields a
    # lane-dense (1, TM) row, so the store is an unmasked contiguous slab.
    logits = jax.lax.dot_general(
        w_ref[...], x_ref[...],
        dimension_numbers=(((1,), (1,)), ((), ())),
        preferred_element_type=jnp.float32,
    )                                    # (1, TM) f32
    logits = logits + b_ref[0]           # scalar bias from SMEM
    o_ref[...] = jax.nn.sigmoid(logits).astype(o_ref.dtype)


def logistic_regression_forward(x, w, b, *, stream_bf16: bool = False,
                                tm_override=None):
    """sigmoid(x @ w.T + b), matching torch.sigmoid(nn.Linear(F, 1)(x)).

    x: [B, F], w: [1, F] (torch nn.Linear weight layout), b: [1] f32.
    Returns [B, 1] f32 probabilities.
    """
    B, F = x.shape
    assert w.shape == (1, F) and b.shape == (1,)

    # Optional bf16 streaming of the HBM-bound operand; MXU accumulation and the
    # sigmoid stay f32.  Default off -> bit-for-bit the f32 reference math.
    if stream_bf16:
        x = x.astype(jnp.bfloat16)
        w = w.astype(jnp.bfloat16)
    itemsize = jnp.dtype(x.dtype).itemsize
    f_lanes = _round_up(F, 128)

    vmem_cap = _vmem_capacity_bytes()
    if tm_override is not None:
        assert tm_override % 128 == 0, "tm_override must be a multiple of 128"
        tm = tm_override
    else:
        tm = _choose_tm(B, F, itemsize, vmem_cap)

    cost = pl.CostEstimate(
        flops=2 * B * F,                 # one (1,F) x (F,B) matvec
        transcendentals=B,               # one exp per sample (sigmoid)
        bytes_accessed=B * F * itemsize + F * itemsize + B * 4 + 4,
    )

    if _round_up(B, 8) <= tm:
        # ---- Single-tile path (small batches): blocks == full arrays, grid=(1,).
        rows = _round_up(B, 8)
        if rows != B:
            x = jnp.pad(x, ((0, rows - B), (0, 0)))      # <= 7 rows, negligible
        grid = (1,)
        out_cols = rows
        tile_rows = rows
        num_x_bufs = 1
        x_spec = pl.BlockSpec((rows, F), lambda i: (0, 0))
        o_spec = pl.BlockSpec((1, rows), lambda i: (0, 0))
    else:
        # ---- Streamed path: no padding, no wrapper copy of X.  The last tile is
        # ragged: OOB input rows only feed output columns whose writes Pallas
        # masks, and OOB output columns are never written back to HBM.
        grid = (pl.cdiv(B, tm),)
        out_cols = B
        tile_rows = tm
        num_x_bufs = 2                   # double-buffered by the Pallas pipeline
        x_spec = pl.BlockSpec((tm, F), lambda i: (i, 0))
        o_spec = pl.BlockSpec((1, tm), lambda i: (0, i))
        # TODO(synk): for F << 128 with very large B, fold k=128//F samples per
        # lane row (block-diagonal weight) to avoid 128-byte DMA rows; and/or
        # pipeline_mode=pl.Buffered(3) on the X spec.  Minor follow-on wins.

    # Scoped-VMEM limit: actual buffer usage plus headroom, never above ~90% of
    # physical VMEM (v5e's 16 MiB / v6e's 32 MiB scoped defaults are too small
    # for multi-MiB tiles; v7x's 64 MiB physical is the binding ceiling).
    vmem_use = (num_x_bufs * tile_rows * f_lanes * itemsize   # X buffers
                + 2 * 8 * f_lanes * itemsize                  # weight blocks
                + 2 * 8 * _round_up(tile_rows, 128) * 4)      # output blocks
    vmem_limit = min(int(vmem_cap * 0.9), max(vmem_use + (4 << 20), 16 << 20))

    out = pl.pallas_call(
        _logreg_kernel,
        out_shape=jax.ShapeDtypeStruct((1, out_cols), jnp.float32),
        grid=grid,
        in_specs=[
            x_spec,                                              # streamed X tile
            pl.BlockSpec((1, F), lambda i: (0, 0)),              # resident weight
            pl.BlockSpec(memory_space=pltpu.MemorySpace.SMEM),   # scalar bias
        ],
        out_specs=o_spec,                                        # lane-dense row
        compiler_params=pltpu.CompilerParams(
            dimension_semantics=("parallel",),                   # megacore on v7x
            vmem_limit_bytes=vmem_limit,
        ),
        cost_estimate=cost,
    )(x, w, b)

    # (1, out_cols) lane-dense row -> (B, 1) column (drops any padded tail).
    return out.reshape(-1)[:B, None]


if __name__ == "__main__":
    key = jax.random.PRNGKey(0)
    k_x, k_w, k_b = jax.random.split(key, 3)

    batch = 8
    num_features = 32

    # Deterministic synthetic data; standardize like the reference script
    # (X - X.mean(axis=0)) / X.std(axis=0)  -- plain-JAX preprocessing.
    X = jax.random.normal(k_x, (batch, num_features), dtype=jnp.float32) * 3.0 + 1.5
    X = (X - X.mean(axis=0)) / X.std(axis=0)

    # torch.nn.Linear-style init: weight (1, F), bias (1,), U(-1/sqrt(F), 1/sqrt(F)).
    bound = 1.0 / jnp.sqrt(jnp.float32(num_features))
    W = jax.random.uniform(k_w, (1, num_features), jnp.float32, -bound, bound)
    b = jax.random.uniform(k_b, (1,), jnp.float32, -bound, bound)

    # Exact-f32 reference (elementwise multiply + sum).
    def ref_fn(xx):
        return jax.nn.sigmoid(jnp.sum(xx * W, axis=-1, keepdims=True) + b)

    # 1) Small batch: single full-block tile.
    prob = jax.block_until_ready(logistic_regression_forward(X, W, b))
    assert prob.shape == (batch, 1)
    assert jnp.allclose(prob, ref_fn(X), atol=1e-5), "mismatch vs reference (small batch)"

    # 2) Streamed multi-tile path with a ragged last tile (B=300, TM=128 -> 3 tiles),
    #    exercising the no-padding / masked-tail-write path.
    batch2 = 300
    X2 = jax.random.normal(jax.random.PRNGKey(1), (batch2, num_features), jnp.float32)
    prob2 = jax.block_until_ready(
        logistic_regression_forward(X2, W, b, tm_override=128))
    assert prob2.shape == (batch2, 1)
    assert jnp.allclose(prob2, ref_fn(X2), atol=1e-5), "mismatch vs reference (ragged tiles)"

    # 3) Optional bf16 streaming (halves HBM bytes); looser tolerance vs f32 ref.
    prob3 = jax.block_until_ready(
        logistic_regression_forward(X, W, b, stream_bf16=True))
    assert prob3.shape == (batch, 1)
    assert jnp.allclose(prob3, ref_fn(X), atol=1e-2), "mismatch vs reference (bf16 stream)"

    print("KERNEL_OK")
</pallas_src>

<mosaic_0001>
module attributes {stable_mosaic.version = 11 : i64} {
  func.func @_logreg_kernel(%arg0: i32, %arg1: memref<8x32xf32, #tpu.memory_space<vmem>>, %arg2: memref<1x32xf32, #tpu.memory_space<vmem>>, %arg3: memref<1xf32, #tpu.memory_space<smem>>, %arg4: memref<1x8xf32, #tpu.memory_space<vmem>>) attributes {dimension_semantics = [#tpu.dimension_semantics<parallel>], iteration_bounds = array<i64: 1>, scalar_prefetch = 0 : i64, scratch_operands = 0 : i64, tpu.core_type = #tpu.core_type<tc>, window_params = [{pipeline_mode = #tpu.pipeline_mode<synchronous>, transform_indices = @transform_0, window_bounds = array<i64: 8, 32>}, {pipeline_mode = #tpu.pipeline_mode<synchronous>, transform_indices = @transform_1, window_bounds = array<i64: 1, 32>}, {transform_indices = @transform_2, window_bounds = array<i64: 1>}, {pipeline_mode = #tpu.pipeline_mode<synchronous>, transform_indices = @transform_3, window_bounds = array<i64: 1, 8>}]} {
    %c0 = arith.constant 0 : index
    %c0_0 = arith.constant 0 : index
    %0 = vector.load %arg2[%c0, %c0_0] : memref<1x32xf32, #tpu.memory_space<vmem>>, vector<1x32xf32>
    %c0_1 = arith.constant 0 : index
    %c0_2 = arith.constant 0 : index
    %1 = vector.load %arg1[%c0_1, %c0_2] : memref<8x32xf32, #tpu.memory_space<vmem>>, vector<8x32xf32>
    %cst = arith.constant dense<0.000000e+00> : vector<1x8xf32>
    %2 = tpu.matmul %0, %1, %cst {dimension_numbers = #tpu.dot_dimension_numbers<[1], [1], [0], [0], [0, 0, 1, 0], [], []>} : vector<1x32xf32>, vector<8x32xf32>, vector<1x8xf32> -> vector<1x8xf32>
    %c0_3 = arith.constant 0 : index
    %3 = memref.load %arg3[%c0_3] : memref<1xf32, #tpu.memory_space<smem>>
    %4 = vector.broadcast %3 : f32 to vector<1x8xf32>
    %5 = arith.addf %2, %4 : vector<1x8xf32>
    %6 = arith.negf %5 : vector<1x8xf32>
    %7 = math.exp %6 : vector<1x8xf32>
    %cst_4 = arith.constant 1.000000e+00 : f32
    %8 = vector.broadcast %cst_4 : f32 to vector<1x8xf32>
    %9 = arith.addf %8, %7 : vector<1x8xf32>
    %10 = arith.divf %8, %9 : vector<1x8xf32>
    %c0_5 = arith.constant 0 : index
    %c0_6 = arith.constant 0 : index
    %11 = vector.load %arg4[%c0_5, %c0_6] : memref<1x8xf32, #tpu.memory_space<vmem>>, vector<1x8xf32>
    tpu.vector_store %arg4[%c0_5, %c0_6], %10 {strides = array<i32>} : memref<1x8xf32, #tpu.memory_space<vmem>>, vector<1x8xf32>,
    return
  }
  func.func @transform_0(%arg0: i32) -> (i32, i32) {
    %c0_i32 = arith.constant 0 : i32
    %c0_i32_0 = arith.constant 0 : i32
    %c0_i32_1 = arith.constant 0 : i32
    return %c0_i32, %c0_i32_0 : i32, i32
  }
  func.func @transform_1(%arg0: i32) -> (i32, i32) {
    %c0_i32 = arith.constant 0 : i32
    %c0_i32_0 = arith.constant 0 : i32
    %c0_i32_1 = arith.constant 0 : i32
    return %c0_i32, %c0_i32_0 : i32, i32
  }
  func.func @transform_2(%arg0: i32) -> i32 {
    %c0_i32 = arith.constant 0 : i32
    %c0_i32_0 = arith.constant 0 : i32
    return %c0_i32 : i32
  }
  func.func @transform_3(%arg0: i32) -> (i32, i32) {
    %c0_i32 = arith.constant 0 : i32
    %c0_i32_0 = arith.constant 0 : i32
    %c0_i32_1 = arith.constant 0 : i32
    return %c0_i32, %c0_i32_0 : i32, i32
  }
}

</mosaic_0001>

<bundles_post_ra>
// kernel: tpu_custom_call.1
= control target key start
LH: loop header
LB: loop body
LE: loop exit
PB: predicated region body
PF: predicated region fallthrough
CT: control target
= control target key end

     0   :  { %9 = vsyncpa [#allocation4], 0  ;;  %s252_s0 = inlined_call_operand.hbm [shape: f32[8,32], index: 0, kind: input, shape index: {}]   ;;  %s253_s1 = inlined_call_operand.vmem [shape: f32[1,32], index: 1, kind: input, shape index: {}]   ;;  %s254_s2 = inlined_call_operand.<no memory space> [shape: f32[1], index: 2, kind: input, shape index: {}]   ;;  %s255_s3 = inlined_call_operand.hbm [shape: f32[1,8], index: 3, kind: output, shape index: {}]  }
   0x1   :  { %10 = vsyncpa [#allocation5], 0  ;;  %s198_s12 = smov [#allocation3]   ;;  %s150_s16 = scalar_lea.hbm %s252_s0, 128 }
   0x2   :  { %s17_s13 = sshll.u32 %s198_s12, 4  ;;  %p151_p0 = scmp.ne.s32.totalorder %s252_s0, %s150_s16  ;;  %s18_s13 = int_to_ptr.vmem [resolvable:$true] %s17_s13 }
   0x3   :  { %p154_p1 = scmp.lt.u32.totalorder %s150_s16, %s252_s0 }
   0x5   :  { %p156_p2 = pnand %p154_p1, %p151_p0 }
   0x7   :  { %159 = shalt.err (!%p156_p2)
}
   0x8   :  { %s160_s21 = scalar_lea.vmem %s18_s13, 128  ;;  %p165_p4 = scmp.lt.s32.totalorder %s18_s13, %s18_s13 }
   0x9   :  { %p161_p3 = scmp.ne.s32.totalorder %s18_s13, %s160_s21  ;;  %p166_p5 = scmp.lt.s32.totalorder %s160_s21, %s160_s21 }
   0xb   :  { %p167_p6 = por %p166_p5, %p165_p4 }
   0xd   :  { %p168_p7 = pnand %p167_p6, %p161_p3 }
   0xf   :  { %171 = shalt.err (!%p168_p7)
}
  0x10   :  { %20 = dma.hbm_to_vmem [thread:$0]  %s252_s0, 128, %s18_s13, [#allocation4]  }
  0x11   :  { %194 = dma.done.wait [#allocation4], 128  }
  0x12   :  { %195 = vsyncadd [#allocation4], 4294967168  ;;  %v199_v0 = vmov 0.0   ;;  %vm200_vm0 = vmmov 0   ;;  %vm32_vm1 = vcmask 261120   ;;  %v29_v1 = vld [vmem:[#allocation3] sm:$0xff]  ;;  %v31_v3 = vstv %s254_s2 }
  0x13   :  { %137 = vmatprep.subr.mxu0 %v199_v0  ;;  %139 = vmatprep.mubr.msk.f32.mxu0 %vm200_vm0, %v199_v0  ;;  %v28_v2 = vld [vmem:[%s253_s1] sm:$0x1]  ;;  %s201_s0 = smov [#allocation6]   ;;  %vm115_vm2 = vcmask 57344  }
  0x14   :  { %138 = vmatpush3.xpose.msk.msra.mxu0 %vm32_vm1, %v29_v1  ;;  %s123_s28 = sshll.u32 %s201_s0, 4  ;;  %s124_s28 = int_to_ptr.vmem [resolvable:$true] %s123_s28 }
  0x15   :  { %s172_s1 = scalar_lea.vmem %s124_s28, 16  ;;  %s176_s29 = scalar_lea.vmem %s124_s28, 32 }
  0x16   :  { %p173_p8 = scmp.ne.s32.totalorder %s124_s28, %s172_s1  ;;  %p177_p9 = scmp.lt.s32.totalorder %s124_s28, %s124_s28 }
  0x17   :  { %140 = vmatmul.mubr.msk.f32.vlgmr.msra.gmra.mrb[0].mxu0 %vm32_vm1, %v28_v2  ;;  %p178_p10 = scmp.lt.s32.totalorder %s176_s29, %s172_s1 }
  0x19   :  { %p179_p11 = por %p178_p10, %p177_p9 }
  0x1b   :  { %p180_p12 = pnand %p179_p11, %p173_p8 }
  0xea   :  { %v105_v4 = vpop.f32.mrb[0].mxu0 }
  0xeb   :  { %v106_v5 = vadd.f32 %v105_v4, %v31_v3  ;;  %v141_v6 = vpop.f32.mrb[1].mxu0 }
  0xed   :  { %v134_v7 = vmul.f32 -1.442695, %v106_v5 }
  0xef   :  { %146 = vpow2.f32 %v134_v7 }
  0xf9   :  { %v147_v8 = vpop.eup %146 }
  0xfa   :  { %v112_v9 = vadd.f32 1.0, %v147_v8 }
  0xfc   :  { %148 = vrcp.f32 %v112_v9 }
 0x106   :  { %v149_v10 = vpop.eup %148 }
 0x107   :  { %116 = vst.msk [vmem:[#allocation6] sm:$0x1] %vm115_vm2, %v149_v10 }
 0x108   :  { %183 = shalt.err (!%p180_p12)
}
 0x109   :  { %s184_s4 = scalar_lea.hbm %s255_s3, 16 }
 0x10a   :  { %p185_p13 = scmp.ne.s32.totalorder %s255_s3, %s184_s4  ;;  %p188_p0 = scmp.lt.u32.totalorder %s184_s4, %s255_s3 }
 0x10c   :  { %p190_p1 = pnand %p188_p0, %p185_p13 }
 0x10e   :  { %193 = shalt.err (!%p190_p1)
}
 0x10f   :  { %126 = dma.vmem_to_hbm [thread:$0]  %s124_s28, 16, %s255_s3, [#allocation5]  }
 0x110   :  { %196 = dma.done.wait [#allocation5], 16  }
 0x111   :  { %197 = vsyncadd [#allocation5], 4294967280 }
 0x112   :  { %130 = vsyncpa [#allocation4], 1 }
 0x113   :  { %131 = vsyncpa [#allocation5], 1 }

</bundles_post_ra>
